<compile_context>
chip_gen: v7x
topology: tpu7x:2x2x1
jax: 0.10.0
libtpu: 0.0.40
codegen_flags: <defaults>
</compile_context>

<pallas_src>
import functools

import jax
import jax.numpy as jnp
from jax.experimental import pallas as pl
from jax.experimental.pallas import tpu as pltpu


# ----------------------------------------------------------------------------
# Variant A: blocked copy kernel, single full-tile store per class block.
# ----------------------------------------------------------------------------
def _prompt_concat_kernel(prefix_ref, ctx_ref, suffix_ref, out_ref):
    # prefix_ref: (C_BLK, 1, D)
    # ctx_ref:    (n_ctx, D)  [generic]  or  (C_BLK, n_ctx, D)  [CSC]
    # suffix_ref: (C_BLK, n_suf, D)
    # out_ref:    (C_BLK, seq, D)
    c_blk = out_ref.shape[0]
    ctx = ctx_ref[...]
    if ctx.ndim == 2:
        # 2-D generic context: broadcast across the class block (the per-class
        # expand() of the PyTorch forward).
        ctx = jnp.broadcast_to(ctx[None], (c_blk,) + ctx.shape)
    # Build the whole (C_BLK, seq, D) block in registers/VMEM and store it with
    # ONE unmasked full-tile store (seq and D are sublane/lane dense), instead
    # of three sublane-misaligned partial stores.
    out_ref[...] = jnp.concatenate(
        [prefix_ref[...], ctx.astype(out_ref.dtype), suffix_ref[...]], axis=1)


def prompt_learner_forward(ctx, token_prefix, token_suffix, *, class_block=64):
    """Pallas PromptLearner.forward (class_token_position='end').

    Args:
      ctx:          (n_ctx, D) generic context, or (n_cls, n_ctx, D) CSC context.
      token_prefix: (n_cls, 1, D) frozen SOS embeddings.
      token_suffix: (n_cls, n_suf, D) frozen class-name + pad embeddings.
      class_block:  classes per grid step (32-128 recommended).

    Returns:
      prompts: (n_cls, seq, D) with seq = 1 + n_ctx + n_suf.
    """
    if ctx.ndim == 2:
        n_ctx, D = ctx.shape
    else:
        _, n_ctx, D = ctx.shape
    n_cls, one, Dp = token_prefix.shape
    assert one == 1 and Dp == D
    n_suf = token_suffix.shape[1]
    seq = 1 + n_ctx + n_suf
    dtype = token_prefix.dtype

    c_blk = min(class_block, n_cls)
    grid = (pl.cdiv(n_cls, c_blk),)

    if ctx.ndim == 2:
        ctx_spec = pl.BlockSpec((n_ctx, D), lambda c: (0, 0))        # shared
    else:
        ctx_spec = pl.BlockSpec((c_blk, n_ctx, D), lambda c: (c, 0, 0))

    itemsize = jnp.dtype(dtype).itemsize
    bytes_accessed = (token_prefix.size + token_suffix.size + ctx.size
                      + n_cls * seq * D) * itemsize

    return pl.pallas_call(
        _prompt_concat_kernel,
        out_shape=jax.ShapeDtypeStruct((n_cls, seq, D), dtype),
        grid=grid,
        in_specs=[
            pl.BlockSpec((c_blk, 1, D), lambda c: (c, 0, 0)),      # prefix
            ctx_spec,                                              # ctx
            pl.BlockSpec((c_blk, n_suf, D), lambda c: (c, 0, 0)),  # suffix
        ],
        out_specs=pl.BlockSpec((c_blk, seq, D), lambda c: (c, 0, 0)),
        compiler_params=pltpu.CompilerParams(
            dimension_semantics=("parallel",),      # shard class blocks across TCs
            vmem_limit_bytes=48 * 1024 * 1024,      # headroom for C_BLK up to ~128
        ),
        cost_estimate=pl.CostEstimate(
            flops=0, transcendentals=0, bytes_accessed=bytes_accessed),
    )(token_prefix, ctx, token_suffix)


# ----------------------------------------------------------------------------
# Variant B: output aliases the frozen embedding; write only the ctx rows.
# ----------------------------------------------------------------------------
def _ctx_scatter_kernel(ctx_ref, emb_hbm_ref, out_hbm_ref, ctx_blk, sem):
    # ctx_ref:     (n_ctx, D) in VMEM (shared generic context)
    # emb_hbm_ref: (n_cls, seq, D) raw HBM ref (aliased to out_hbm_ref)
    # out_hbm_ref: (n_cls, seq, D) raw HBM ref; prefix/suffix rows already valid
    # ctx_blk:     VMEM scratch (C_BLK, n_ctx, D)
    del emb_hbm_ref  # content is already present in the aliased output buffer
    c_blk, n_ctx, _ = ctx_blk.shape
    c = pl.program_id(0)
    # Broadcast the shared ctx across the class block (cheap VPU work; done
    # every step so it is correct when the grid is sharded across TensorCores).
    ctx_blk[...] = jnp.broadcast_to(ctx_ref[...][None], ctx_blk.shape)
    start = pl.multiple_of(c * c_blk, c_blk)
    cp = pltpu.make_async_copy(
        ctx_blk,
        out_hbm_ref.at[pl.ds(start, c_blk), pl.ds(1, n_ctx), :],
        sem)
    cp.start()
    cp.wait()


def prompt_learner_forward_inplace(ctx, embedding, *, class_block=64):
    """Lowest-HBM-traffic variant.

    The full frozen embedding (n_cls, seq, D) is passed in and aliased to the
    output, so prefix/suffix rows are never re-copied; the kernel only writes
    the broadcast ctx rows [1:1+n_ctx] of each class (generic 2-D ctx only).
    """
    n_ctx, D = ctx.shape
    n_cls, seq, De = embedding.shape
    assert De == D and seq > 1 + n_ctx

    # Manual DMA sizes are static -> pick a class block that divides n_cls.
    c_blk = min(class_block, n_cls)
    while n_cls % c_blk:
        c_blk -= 1
    grid = (n_cls // c_blk,)

    itemsize = jnp.dtype(embedding.dtype).itemsize
    bytes_accessed = (ctx.size + n_cls * n_ctx * D) * itemsize

    return pl.pallas_call(
        _ctx_scatter_kernel,
        out_shape=jax.ShapeDtypeStruct((n_cls, seq, D), embedding.dtype),
        grid=grid,
        in_specs=[
            pl.BlockSpec((n_ctx, D), lambda c: (0, 0)),   # ctx -> VMEM (shared)
            pl.BlockSpec(memory_space=pl.ANY),            # embedding stays in HBM
        ],
        out_specs=pl.BlockSpec(memory_space=pl.ANY),      # written by manual DMA
        scratch_shapes=[
            pltpu.VMEM((c_blk, n_ctx, D), embedding.dtype),
            pltpu.SemaphoreType.DMA,
        ],
        input_output_aliases={1: 0},                      # embedding -> output
        compiler_params=pltpu.CompilerParams(
            dimension_semantics=("parallel",),
        ),
        cost_estimate=pl.CostEstimate(
            flops=0, transcendentals=0, bytes_accessed=bytes_accessed),
    )(ctx, embedding)


if __name__ == "__main__":
    # Small, module-consistent shapes: ctx_dim = 768 (BiomedCLIP text width),
    # n_ctx = 4 context tokens, seq = 16 tokenized length, n_cls = 16 classes.
    n_cls, n_ctx, ctx_dim, seq = 16, 4, 768, 16
    n_suf = seq - 1 - n_ctx

    key = jax.random.PRNGKey(0)
    k_ctx, k_emb = jax.random.split(key)

    # nn.init.normal_(ctx_vectors, std=0.02) -- generic (non-CSC) context.
    ctx = (0.02 * jax.random.normal(k_ctx, (n_ctx, ctx_dim))).astype(jnp.float32)

    # Stand-in for the frozen word embeddings of the tokenized prompts
    # (register_buffer token_prefix / token_suffix); deterministic, synthetic.
    embedding = jax.random.normal(k_emb, (n_cls, seq, ctx_dim), dtype=jnp.float32)
    token_prefix = embedding[:, :1, :]            # (n_cls, 1, D)
    token_suffix = embedding[:, 1 + n_ctx:, :]    # (n_cls, n_suf, D)

    # Reference: pure-JAX equivalent of the PyTorch forward (computed first so
    # the aliased/donated variant cannot interfere with it).
    ctx_expanded = jnp.broadcast_to(ctx[None], (n_cls, n_ctx, ctx_dim))
    ref = jax.block_until_ready(
        jnp.concatenate([token_prefix, ctx_expanded, token_suffix], axis=1))

    # Variant A: blocked copy kernel (2 class blocks of 8 -> grid=(2,)).
    prompts = prompt_learner_forward(ctx, token_prefix, token_suffix,
                                     class_block=8)
    prompts = jax.block_until_ready(prompts)
    assert prompts.shape == (n_cls, seq, ctx_dim)
    assert prompts.dtype == jnp.float32
    assert jnp.allclose(prompts, ref), "Variant A mismatch vs reference"

    # Variant B: aliased embedding, ctx-rows-only scatter.
    prompts2 = prompt_learner_forward_inplace(ctx, embedding, class_block=8)
    prompts2 = jax.block_until_ready(prompts2)
    assert prompts2.shape == (n_cls, seq, ctx_dim)
    assert jnp.allclose(prompts2, ref), "Variant B mismatch vs reference"

    print("KERNEL_OK")
</pallas_src>

<mosaic_0001>
module attributes {stable_mosaic.version = 11 : i64} {
  func.func @_prompt_concat_kernel(%arg0: i32, %arg1: memref<8x1x768xf32, #tpu.memory_space<vmem>>, %arg2: memref<4x768xf32, #tpu.memory_space<vmem>>, %arg3: memref<8x11x768xf32, #tpu.memory_space<vmem>>, %arg4: memref<8x16x768xf32, #tpu.memory_space<vmem>>) attributes {dimension_semantics = [#tpu.dimension_semantics<parallel>], iteration_bounds = array<i64: 2>, scalar_prefetch = 0 : i64, scratch_operands = 0 : i64, tpu.core_type = #tpu.core_type<tc>, window_params = [{transform_indices = @transform_0, window_bounds = array<i64: 8, 1, 768>}, {pipeline_mode = #tpu.pipeline_mode<synchronous>, transform_indices = @transform_1, window_bounds = array<i64: 4, 768>}, {transform_indices = @transform_2, window_bounds = array<i64: 8, 11, 768>}, {transform_indices = @transform_3, window_bounds = array<i64: 8, 16, 768>}]} {
    %c0 = arith.constant 0 : index
    %c0_0 = arith.constant 0 : index
    %0 = vector.load %arg2[%c0, %c0_0] : memref<4x768xf32, #tpu.memory_space<vmem>>, vector<4x768xf32>
    %1 = vector.shape_cast %0 : vector<4x768xf32> to vector<1x4x768xf32>
    %2 = vector.shape_cast %1 : vector<1x4x768xf32> to vector<1x4x768xf32>
    %3 = vector.broadcast %2 : vector<1x4x768xf32> to vector<8x4x768xf32>
    %c0_1 = arith.constant 0 : index
    %c0_2 = arith.constant 0 : index
    %c0_3 = arith.constant 0 : index
    %4 = vector.load %arg1[%c0_1, %c0_2, %c0_3] : memref<8x1x768xf32, #tpu.memory_space<vmem>>, vector<8x1x768xf32>
    %c0_4 = arith.constant 0 : index
    %c0_5 = arith.constant 0 : index
    %c0_6 = arith.constant 0 : index
    %5 = vector.load %arg3[%c0_4, %c0_5, %c0_6] : memref<8x11x768xf32, #tpu.memory_space<vmem>>, vector<8x11x768xf32>
    %6 = tpu.concatenate %4, %3, %5 in 1 : vector<8x1x768xf32>, vector<8x4x768xf32>, vector<8x11x768xf32> -> vector<8x16x768xf32>
    %c0_7 = arith.constant 0 : index
    %c0_8 = arith.constant 0 : index
    %c0_9 = arith.constant 0 : index
    %7 = vector.load %arg4[%c0_7, %c0_8, %c0_9] : memref<8x16x768xf32, #tpu.memory_space<vmem>>, vector<8x16x768xf32>
    tpu.vector_store %arg4[%c0_7, %c0_8, %c0_9], %6 {strides = array<i32>} : memref<8x16x768xf32, #tpu.memory_space<vmem>>, vector<8x16x768xf32>,
    return
  }
  func.func @transform_0(%arg0: i32) -> (i32, i32, i32) {
    %c0_i32 = arith.constant 0 : i32
    %c0_i32_0 = arith.constant 0 : i32
    %c0_i32_1 = arith.constant 0 : i32
    return %arg0, %c0_i32, %c0_i32_0 : i32, i32, i32
  }
  func.func @transform_1(%arg0: i32) -> (i32, i32) {
    %c0_i32 = arith.constant 0 : i32
    %c0_i32_0 = arith.constant 0 : i32
    %c0_i32_1 = arith.constant 0 : i32
    return %c0_i32, %c0_i32_0 : i32, i32
  }
  func.func @transform_2(%arg0: i32) -> (i32, i32, i32) {
    %c0_i32 = arith.constant 0 : i32
    %c0_i32_0 = arith.constant 0 : i32
    %c0_i32_1 = arith.constant 0 : i32
    return %arg0, %c0_i32, %c0_i32_0 : i32, i32, i32
  }
  func.func @transform_3(%arg0: i32) -> (i32, i32, i32) {
    %c0_i32 = arith.constant 0 : i32
    %c0_i32_0 = arith.constant 0 : i32
    %c0_i32_1 = arith.constant 0 : i32
    return %arg0, %c0_i32, %c0_i32_0 : i32, i32, i32
  }
}

</mosaic_0001>

<bundles_post_ra>
// kernel: tpu_custom_call.1
= control target key start
LH: loop header
LB: loop body
LE: loop exit
PB: predicated region body
PF: predicated region fallthrough
CT: control target
= control target key end

     0   :  { %8 = vsyncpa [#allocation3], 0  ;;  %s2026_s0 = inlined_call_operand.vmem [shape: f32[16,1,768], index: 0, kind: input, shape index: {}]   ;;  %s2027_s1 = inlined_call_operand.vmem [shape: f32[4,768], index: 1, kind: input, shape index: {}]   ;;  %s2028_s2 = inlined_call_operand.vmem [shape: f32[16,11,768], index: 2, kind: input, shape index: {}]   ;;  %s2029_s3 = inlined_call_operand.hbm [shape: f32[16,16,768], index: 3, kind: output, shape index: {}]  }
   0x1   :  { %10 = vsyncpa [#allocation3 + $0x1], 0  ;;  %s1336_s12 = smov 0   ;;  %s1338_s13 = smov 0  }
   0x2   :  { %s1340_s14 = smov 0   ;;  %s1342_s15 = smov 0  }
   0x3 LB: > { %s1357_s16 = sadd.s32 4294967295, %s1311_s15   ;;  %s1189_s17 = sadd.s32 4294967294, %s1311_s15   ;;  %s1311_s15 = sphi %s1342_s15, %s2035_s15   ;;  %s1307_s14 = sphi %s1340_s14, %s2034_s14   ;;  %s1303_s13 = sphi %s1338_s13, %s2033_s13   ;;  %s1299_s12 = sphi %s1336_s12, %s2032_s12  }
   0x4   : > { %s1361_s18 = sadd.s32 1, %s1311_s15   ;;  %s96_s19 = sadd.s32 1, %s1307_s14 }
   0x5   : > { %s93_s20 = ssub.s32 %s1311_s15, %s1361_s18  ;;  %p106_p0 = scmp.ne.s32.totalorder %s1307_s14, %s1303_s13 }
   0x6   : > { %p94_p1 = scmp.eq.s32.totalorder %s93_s20, 0  ;;  %p107_p2 = scmp.eq.s32.totalorder %s1357_s16, 1 }
   0x7   : > { %p112_p3 = scmp.ne.s32.totalorder %s1303_s13, %s1299_s12  ;;  %p113_p4 = scmp.eq.s32.totalorder %s1189_s17, 1 }
   0x8   : > { %s1372_s21 = scalar_select %p94_p1, %s1307_s14, %s96_s19  }
   0x9   : > { %p1374_p5 = por %p107_p2, %p106_p0  ;;  %p1378_p6 = por %p113_p4, %p112_p3 }
   0xa   : > { %p1192_p7 = scmp.ge.s32.totalorder %s1311_s15, 1  ;;  %p153_p8 = scmp.lt.s32.totalorder %s1311_s15, 3 }
   0xc   : > { %p154_p9 = pnand %p1192_p7, %p153_p8 }
   0xd   : > { %s1193_s24 = sshll.u32 (!%p154_p9), %s1357_s16, 3  ;;  %v312_v0 = vlaneseq (!%p154_p9)  ;;  %v197_v1 = vld [vmem:[%s2027_s1] sm:$0xff] (!%p154_p9)  ;;  %s180_s27 = sand.u32 (!%p154_p9), 1, %s1303_s13   ;;  %v198_v3 = vld [vmem:[%s2027_s1 + $0x8] sm:$0xff] (!%p154_p9)  ;;  %v199_v4 = vld [vmem:[%s2027_s1 + $0x10] sm:$0xff] (!%p154_p9)  ;;  %vm666_vm0 = vcmask (!%p154_p9), 1044480  }
   0xe   : > { %157 = sbr.rel (%p154_p9) target bundleno = 115 (0x73), region = 32  ;;  %p184_p10 = scmp.lt.s32.totalorder (!%p154_p9), %s1193_s24, 15  ;;  %v555_v5 = vcombine.high (!%p154_p9), %v197_v1, %v197_v1  ;;  %v556_v6 = vcombine.high (!%p154_p9), %v198_v3, %v198_v3  ;;  %v557_v7 = vcombine.high (!%p154_p9), %v199_v4, %v199_v4  ;;  %v1414_v13 = vrot.slane (!%p154_p9), %v197_v1, 7 }
   0xf   : > { %v313_v2 = vshrl.u32 (!%p154_p9), %v312_v0, 7  ;;  %s1397_s5 = smul.u32 (!%p154_p9), 768, %s180_s27  ;;  %vm907_vm1 = vcmask (!%p154_p9), 1040384   ;;  %v1418_v15 = vrot.slane (!%p154_p9), %v198_v3, 7  ;;  %v1428_v18 = vrot.slane (!%p154_p9), %v199_v4, 7  ;;  %s1985_s29 = scalar_lea.sflag (!%p154_p9), [#allocation3], %s180_s27 }
  0x10   : > { %v1416_v14 = vrot.slane (!%p154_p9), %v555_v5, 7  ;;  %v1426_v17 = vrot.slane (!%p154_p9), %v556_v6, 7  ;;  %v1432_v20 = vrot.slane (!%p154_p9), %v557_v7, 7  ;;  %s1313_s4 = smov (!%p154_p9), [#allocation2]  }
  0x11   : > { %v1399_v8 = vsub.s32 (!%p154_p9), 0, %v313_v2  ;;  %v1401_v9 = vsub.s32 (!%p154_p9), 1, %v313_v2  ;;  %v1403_v10 = vsub.s32 (!%p154_p9), 2, %v313_v2  ;;  %v1405_v11 = vsub.s32 (!%p154_p9), 3, %v313_v2  ;;  %s1462_s20 = scalar_lea.vmem (!%p154_p9), [#allocation2], %s1397_s5  ;;  %s1253_s5 = sshll.u32 (!%p154_p9), %s1313_s4, 4  ;;  %s1254_s5 = int_to_ptr.vmem [resolvable:$false] %s1253_s5 }
  0x12   : > { %v1407_v12 = vsub.s32 (!%p154_p9), 4, %v313_v2  ;;  %v1430_v19 = vsub.s32 (!%p154_p9), 5, %v313_v2 }
  0x15   : > { %s2037_s24 = smov (!%p184_p10, %s1193_s24), 15 }
  0x16   : > { %s1202_s6 = smul.u32 6, %s2037_s24 }
  0x17   : > { %s1203_s7 = smul.u32 96, %s2037_s24 }
  0x18   : > { %s1412_s10 = scalar_lea.vmem %s2026_s0, %s1202_s6  ;;  %s1204_s24 = smul.u32 12288, %s1357_s16 }
  0x19   : > { %s1423_s19 = scalar_lea.vmem %s2028_s2, %s1203_s7  ;;  %v200_v16 = vld [vmem:[%s1412_s10] sm:$0x3f]  ;;  %v1472_v52 = vld [vmem:[%s1412_s10 + $0x6] sm:$0x3f]  ;;  %s1115_s16 = sshll.u32 %s1462_s20, 4  ;;  %s1979_s16 = int_to_ptr.vmem [resolvable:$true] %s1115_s16 }
  0x1a   : > { %v208_v21 = vld [vmem:[%s1423_s19] sm:$0xff]  ;;  %v315_v22 = vrot.slane %v200_v16, %v1399_v8  ;;  %v209_v23 = vld [vmem:[%s1423_s19 + $0x8] sm:$0xff]  ;;  %v319_v24 = vrot.slane %v200_v16, %v1401_v9  ;;  %v210_v25 = vld [vmem:[%s1423_s19 + $0x10] sm:$0xff]  ;;  %v323_v26 = vrot.slane %v200_v16, %v1403_v10  ;;  %v327_v27 = vrot.slane %v200_v16, %v1405_v11  ;;  %s1975_s28 = scalar_lea.hbm %s2029_s3, %s1204_s24  ;;  %s1249_s30 = scalar_lea.vmem %s1979_s16, 12288 }
  0x1b   : > { %v667_v28 = vrot.slane %v208_v21, 3  ;;  %v668_v29 = vrot.slane %v209_v23, 3  ;;  %v669_v30 = vrot.slane %v210_v25, 3  ;;  %v211_v31 = vld [vmem:[%s1423_s19 + $0x18] sm:$0xff]  ;;  %v212_v32 = vld [vmem:[%s1423_s19 + $0x20] sm:$0xff]  ;;  %v331_v33 = vrot.slane %v200_v16, %v1407_v12  ;;  %v213_v38 = vld [vmem:[%s1423_s19 + $0x28] sm:$0xff]  ;;  %p1250_p11 = scmp.ne.s32.totalorder %s1979_s16, %s1249_s30  ;;  %p1256_p0 = scmp.lt.s32.totalorder %s1979_s16, %s1254_s5 }
  0x1c   : > { %v908_v34 = vsel %vm907_vm1, %v315_v22, %v1414_v13  ;;  %v909_v35 = vsel %vm907_vm1, %v319_v24, %v1416_v14  ;;  %v910_v36 = vsel %vm907_vm1, %v323_v26, %v1418_v15  ;;  %v670_v37 = vrot.slane %v211_v31, 3  ;;  %v214_v39 = vld [vmem:[%s1423_s19 + $0x30] sm:$0x7]  ;;  %v215_v40 = vld [vmem:[%s1423_s19 + $0x38] sm:$0x7]  ;;  %v1480_v62 = vld [vmem:[%s1423_s19 + $0x60] sm:$0xff] }
  0x1d   : > { %v956_v41 = vsel %vm666_vm0, %v908_v34, %v667_v28  ;;  %v957_v42 = vsel %vm666_vm0, %v909_v35, %v668_v29  ;;  %v958_v43 = vsel %vm666_vm0, %v910_v36, %v669_v30  ;;  %v911_v44 = vsel %vm907_vm1, %v327_v27, %v1426_v17  ;;  %v216_v45 = vld [vmem:[%s1423_s19 + $0x40] sm:$0x7]  ;;  %v217_v46 = vld [vmem:[%s1423_s19 + $0x48] sm:$0x7]  ;;  %v218_v47 = vld [vmem:[%s1423_s19 + $0x50] sm:$0x7]  ;;  %p1251_p12 = pnand %p1250_p11, %p1374_p5 }
  0x1e   : > { %1004 = vst [vmem:[%s1462_s20] sm:$0xff] %v956_v41  ;;  %1005 = vst [vmem:[%s1462_s20 + $0x8] sm:$0xff] %v957_v42  ;;  %v959_v48 = vsel %vm666_vm0, %v911_v44, %v670_v37  ;;  %v671_v49 = vrot.slane %v212_v32, 3  ;;  %v912_v50 = vsel %vm907_vm1, %v331_v33, %v1428_v18  ;;  %v335_v51 = vrot.slane %v200_v16, %v1430_v19  ;;  %v219_v57 = vld [vmem:[%s1423_s19 + $0x58] sm:$0x7]  ;;  %v1483_v63 = vld [vmem:[%s1423_s19 + $0x68] sm:$0xff]  ;;  %s1255_s6 = scalar_lea.vmem %s1254_s5, 24576 }
  0x1f   : > { %1006 = vst [vmem:[%s1462_s20 + $0x10] sm:$0xff] %v958_v43  ;;  %1007 = vst [vmem:[%s1462_s20 + $0x18] sm:$0xff] %v959_v48  ;;  %v672_v53 = vrot.slane %v213_v38, 3  ;;  %v673_v54 = vrot.slane %v214_v39, 3  ;;  %v675_v55 = vrot.slane %v215_v40, 3  ;;  %v677_v56 = vrot.slane %v216_v45, 3  ;;  %p1252_p13 = pneg %p1251_p12  ;;  %p1257_p1 = scmp.lt.s32.totalorder %s1255_s6, %s1249_s30 }
  0x20   : > { %v960_v58 = vsel %vm666_vm0, %v912_v50, %v671_v49  ;;  %v913_v59 = vsel %vm907_vm1, %v335_v51, %v1432_v20  ;;  %v679_v60 = vrot.slane %v217_v46, 3  ;;  %v681_v61 = vrot.slane %v218_v47, 3  ;;  %v222_v4 = vld [vmem:[%s1423_s19 + $0x70] sm:$0xff]  ;;  %v223_v21 = vld [vmem:[%s1423_s19 + $0x78] sm:$0xff]  ;;  %v225_v31 = vld [vmem:[%s1423_s19 + $0x88] sm:$0xff] }
  0x21   : > { %1008 = vst [vmem:[%s1462_s20 + $0x20] sm:$0xff] %v960_v58  ;;  %v961_v0 = vsel %vm666_vm0, %v913_v59, %v672_v53  ;;  %v674_v1 = vsel %vm666_vm0, %v667_v28, %v673_v54  ;;  %v676_v2 = vsel %vm666_vm0, %v668_v29, %v675_v55  ;;  %v678_v3 = vsel %vm666_vm0, %v669_v30, %v677_v56  ;;  %v224_v30 = vld [vmem:[%s1423_s19 + $0x80] sm:$0xff]  ;;  %v226_v32 = vld [vmem:[%s1423_s19 + $0x90] sm:$0x7]  ;;  %v229_v43 = vld [vmem:[%s1423_s19 + $0xa8] sm:$0x7]  ;;  %p1258_p2 = por %p1257_p1, %p1256_p0 }
  0x22   : > { %1009 = vst [vmem:[%s1462_s20 + $0x28] sm:$0xff] %v961_v0  ;;  %1010 = vst [vmem:[%s1462_s20 + $0x30] sm:$0xff] %v674_v1  ;;  %v680_v5 = vsel %vm666_vm0, %v670_v37, %v679_v60  ;;  %v682_v6 = vsel %vm666_vm0, %v671_v49, %v681_v61  ;;  %v683_v7 = vrot.slane %v219_v57, 3  ;;  %v339_v16 = vrot.slane %v1472_v52, %v1399_v8  ;;  %v227_v37 = vld [vmem:[%s1423_s19 + $0x98] sm:$0x7]  ;;  %v1549_v59 = vld [vmem:[%s1423_s19 + $0xc0] sm:$0xff] }
  0x23   : > { %1011 = vst [vmem:[%s1462_s20 + $0x38] sm:$0xff] %v676_v2  ;;  %1012 = vst [vmem:[%s1462_s20 + $0x40] sm:$0xff] %v678_v3  ;;  %v685_v22 = vrot.slane %v1480_v62, 3  ;;  %v343_v23 = vrot.slane %v1472_v52, %v1401_v9  ;;  %v686_v24 = vrot.slane %v1483_v63, 3  ;;  %v347_v25 = vrot.slane %v1472_v52, %v1403_v10  ;;  %v228_v38 = vld [vmem:[%s1423_s19 + $0xa0] sm:$0x7]  ;;  %p1259_p3 = pnand %p1258_p2, %p1252_p13 }
  0x24   : > { %1013 = vst [vmem:[%s1462_s20 + $0x48] sm:$0xff] %v680_v5  ;;  %1014 = vst [vmem:[%s1462_s20 + $0x50] sm:$0xff] %v682_v6  ;;  %v684_v26 = vsel %vm666_vm0, %v672_v53, %v683_v7  ;;  %v914_v27 = vsel %vm907_vm1, %v339_v16, %v1414_v13  ;;  %v687_v28 = vrot.slane %v222_v4, 3  ;;  %v351_v29 = vrot.slane %v1472_v52, %v1405_v11  ;;  %v230_v44 = vld [vmem:[%s1423_s19 + $0xb0] sm:$0x7]  ;;  %v1552_v60 = vld [vmem:[%s1423_s19 + $0xc8] sm:$0xff] }
  0x25   : > { %1015 = vst [vmem:[%s1462_s20 + $0x58] sm:$0xff] %v684_v26  ;;  %v962_v33 = vsel %vm666_vm0, %v914_v27, %v685_v22  ;;  %v915_v34 = vsel %vm907_vm1, %v343_v23, %v1416_v14  ;;  %v916_v35 = vsel %vm907_vm1, %v347_v25, %v1418_v15  ;;  %v688_v36 = vrot.slane %v223_v21, 3  ;;  %v1539_v49 = vld [vmem:[%s1412_s10 + $0xc] sm:$0x3f]  ;;  %v231_v55 = vld [vmem:[%s1423_s19 + $0xb8] sm:$0x7] }
  0x26   : > { %1016 = vst [vmem:[%s1462_s20 + $0x60] sm:$0xff] %v962_v33  ;;  %v963_v39 = vsel %vm666_vm0, %v915_v34, %v686_v24  ;;  %v964_v40 = vsel %vm666_vm0, %v916_v35, %v687_v28  ;;  %v917_v41 = vsel %vm907_vm1, %v351_v29, %v1426_v17  ;;  %v355_v42 = vrot.slane %v1472_v52, %v1407_v12  ;;  %v234_v1 = vld [vmem:[%s1423_s19 + $0xd0] sm:$0xff]  ;;  %v235_v6 = vld [vmem:[%s1423_s19 + $0xd8] sm:$0xff]  ;;  %v236_v27 = vld [vmem:[%s1423_s19 + $0xe0] sm:$0xff] }
  0x27   : > { %1017 = vst [vmem:[%s1462_s20 + $0x68] sm:$0xff] %v963_v39  ;;  %1018 = vst [vmem:[%s1462_s20 + $0x70] sm:$0xff] %v964_v40  ;;  %v965_v45 = vsel %vm666_vm0, %v917_v41, %v688_v36  ;;  %v689_v46 = vrot.slane %v224_v30, 3  ;;  %v359_v47 = vrot.slane %v1472_v52, %v1430_v19  ;;  %v690_v48 = vrot.slane %v225_v31, 3  ;;  %v238_v29 = vld [vmem:[%s1423_s19 + $0xf0] sm:$0x7] }
  0x28   : > { %1019 = vst [vmem:[%s1462_s20 + $0x78] sm:$0xff] %v965_v45  ;;  %v918_v50 = vsel %vm907_vm1, %v355_v42, %v1428_v18  ;;  %v691_v51 = vrot.slane %v226_v32, 3  ;;  %v693_v53 = vrot.slane %v227_v37, 3  ;;  %v695_v54 = vrot.slane %v228_v38, 3  ;;  %v239_v34 = vld [vmem:[%s1423_s19 + $0xf8] sm:$0x7] }
  0x29   : > { %v966_v56 = vsel %vm666_vm0, %v918_v50, %v689_v46  ;;  %v919_v52 = vsel %vm907_vm1, %v359_v47, %v1432_v20  ;;  %v697_v57 = vrot.slane %v229_v43, 3  ;;  %v699_v58 = vrot.slane %v230_v44, 3  ;;  %v240_v35 = vld [vmem:[%s1423_s19 + $0x100] sm:$0x7]  ;;  %v241_v40 = vld [vmem:[%s1423_s19 + $0x108] sm:$0x7] }
  0x2a   : > { %1020 = vst [vmem:[%s1462_s20 + $0x80] sm:$0xff] %v966_v56  ;;  %v967_v61 = vsel %vm666_vm0, %v919_v52, %v690_v48  ;;  %v692_v62 = vsel %vm666_vm0, %v685_v22, %v691_v51  ;;  %v694_v63 = vsel %vm666_vm0, %v686_v24, %v693_v53  ;;  %v696_v0 = vsel %vm666_vm0, %v687_v28, %v695_v54  ;;  %v237_v28 = vld [vmem:[%s1423_s19 + $0xe8] sm:$0xff]  ;;  %v242_v41 = vld [vmem:[%s1423_s19 + $0x110] sm:$0x7]  ;;  %v1618_v52 = vld [vmem:[%s1423_s19 + $0x120] sm:$0xff] }
  0x2b   : > { %1021 = vst [vmem:[%s1462_s20 + $0x88] sm:$0xff] %v967_v61  ;;  %1022 = vst [vmem:[%s1462_s20 + $0x90] sm:$0xff] %v692_v62  ;;  %v698_v2 = vsel %vm666_vm0, %v688_v36, %v697_v57  ;;  %v700_v3 = vsel %vm666_vm0, %v689_v46, %v699_v58  ;;  %v701_v4 = vrot.slane %v231_v55, 3  ;;  %v363_v5 = vrot.slane %v1539_v49, %v1399_v8  ;;  %v243_v46 = vld [vmem:[%s1423_s19 + $0x118] sm:$0x7]  ;;  %v1621_v57 = vld [vmem:[%s1423_s19 + $0x128] sm:$0xff] }
  0x2c   : > { %1023 = vst [vmem:[%s1462_s20 + $0x98] sm:$0xff] %v694_v63  ;;  %1024 = vst [vmem:[%s1462_s20 + $0xa0] sm:$0xff] %v696_v0  ;;  %v703_v7 = vrot.slane %v1549_v59, 3  ;;  %v367_v16 = vrot.slane %v1539_v49, %v1401_v9  ;;  %v704_v21 = vrot.slane %v1552_v60, 3  ;;  %v371_v22 = vrot.slane %v1539_v49, %v1403_v10  ;;  %v1612_v53 = vld [vmem:[%s1412_s10 + $0x12] sm:$0x3f] }
  0x2d   : > { %1025 = vst [vmem:[%s1462_s20 + $0xa8] sm:$0xff] %v698_v2  ;;  %1026 = vst [vmem:[%s1462_s20 + $0xb0] sm:$0xff] %v700_v3  ;;  %v702_v23 = vsel %vm666_vm0, %v690_v48, %v701_v4  ;;  %v920_v24 = vsel %vm907_vm1, %v363_v5, %v1414_v13  ;;  %v705_v25 = vrot.slane %v234_v1, 3  ;;  %v375_v26 = vrot.slane %v1539_v49, %v1405_v11  ;;  %v246_v62 = vld [vmem:[%s1423_s19 + $0x130] sm:$0xff]  ;;  %v247_v3 = vld [vmem:[%s1423_s19 + $0x138] sm:$0xff] }
  0x2e   : > { %1027 = vst [vmem:[%s1462_s20 + $0xb8] sm:$0xff] %v702_v23  ;;  %v968_v30 = vsel %vm666_vm0, %v920_v24, %v703_v7  ;;  %v921_v31 = vsel %vm907_vm1, %v367_v16, %v1416_v14  ;;  %v922_v32 = vsel %vm907_vm1, %v371_v22, %v1418_v15  ;;  %v706_v33 = vrot.slane %v235_v6, 3  ;;  %v248_v24 = vld [vmem:[%s1423_s19 + $0x140] sm:$0xff] }
  0x2f   : > { %1028 = vst [vmem:[%s1462_s20 + $0xc0] sm:$0xff] %v968_v30  ;;  %v969_v36 = vsel %vm666_vm0, %v921_v31, %v704_v21  ;;  %v970_v37 = vsel %vm666_vm0, %v922_v32, %v705_v25  ;;  %v923_v38 = vsel %vm907_vm1, %v375_v26, %v1426_v17  ;;  %v379_v39 = vrot.slane %v1539_v49, %v1407_v12  ;;  %v250_v26 = vld [vmem:[%s1423_s19 + $0x150] sm:$0x7]  ;;  %v251_v31 = vld [vmem:[%s1423_s19 + $0x158] sm:$0x7] }
  0x30   : > { %1029 = vst [vmem:[%s1462_s20 + $0xc8] sm:$0xff] %v969_v36  ;;  %1030 = vst [vmem:[%s1462_s20 + $0xd0] sm:$0xff] %v970_v37  ;;  %v971_v42 = vsel %vm666_vm0, %v923_v38, %v706_v33  ;;  %v707_v43 = vrot.slane %v236_v27, 3  ;;  %v383_v44 = vrot.slane %v1539_v49, %v1430_v19  ;;  %v708_v45 = vrot.slane %v237_v28, 3  ;;  %v252_v32 = vld [vmem:[%s1423_s19 + $0x160] sm:$0x7] }
  0x31   : > { %1031 = vst [vmem:[%s1462_s20 + $0xd8] sm:$0xff] %v971_v42  ;;  %v924_v47 = vsel %vm907_vm1, %v379_v39, %v1428_v18  ;;  %v709_v48 = vrot.slane %v238_v29, 3  ;;  %v711_v50 = vrot.slane %v239_v34, 3  ;;  %v713_v51 = vrot.slane %v240_v35, 3  ;;  %v253_v37 = vld [vmem:[%s1423_s19 + $0x168] sm:$0x7] }
  0x32   : > { %v972_v54 = vsel %vm666_vm0, %v924_v47, %v707_v43  ;;  %v925_v49 = vsel %vm907_vm1, %v383_v44, %v1432_v20  ;;  %v715_v55 = vrot.slane %v241_v40, 3  ;;  %v717_v56 = vrot.slane %v242_v41, 3  ;;  %v254_v38 = vld [vmem:[%s1423_s19 + $0x170] sm:$0x7] }
  0x33   : > { %1032 = vst [vmem:[%s1462_s20 + $0xe0] sm:$0xff] %v972_v54  ;;  %v973_v58 = vsel %vm666_vm0, %v925_v49, %v708_v45  ;;  %v710_v59 = vsel %vm666_vm0, %v703_v7, %v709_v48  ;;  %v712_v60 = vsel %vm666_vm0, %v704_v21, %v711_v50  ;;  %v714_v61 = vsel %vm666_vm0, %v705_v25, %v713_v51  ;;  %v249_v25 = vld [vmem:[%s1423_s19 + $0x148] sm:$0xff]  ;;  %v1681_v48 = vld [vmem:[%s1412_s10 + $0x18] sm:$0x3f]  ;;  %v1687_v49 = vld [vmem:[%s1423_s19 + $0x180] sm:$0xff] }
  0x34   : > { %1033 = vst [vmem:[%s1462_s20 + $0xe8] sm:$0xff] %v973_v58  ;;  %1034 = vst [vmem:[%s1462_s20 + $0xf0] sm:$0xff] %v710_v59  ;;  %v716_v63 = vsel %vm666_vm0, %v706_v33, %v715_v55  ;;  %v718_v0 = vsel %vm666_vm0, %v707_v43, %v717_v56  ;;  %v719_v1 = vrot.slane %v243_v46, 3  ;;  %v387_v2 = vrot.slane %v1612_v53, %v1399_v8  ;;  %v255_v43 = vld [vmem:[%s1423_s19 + $0x178] sm:$0x7]  ;;  %v1690_v55 = vld [vmem:[%s1423_s19 + $0x188] sm:$0xff] }
  0x35   : > { %1035 = vst [vmem:[%s1462_s20 + $0xf8] sm:$0xff] %v712_v60  ;;  %1036 = vst [vmem:[%s1462_s20 + $0x100] sm:$0xff] %v714_v61  ;;  %v721_v4 = vrot.slane %v1618_v52, 3  ;;  %v391_v5 = vrot.slane %v1612_v53, %v1401_v9  ;;  %v722_v6 = vrot.slane %v1621_v57, 3  ;;  %v395_v7 = vrot.slane %v1612_v53, %v1403_v10  ;;  %v258_v59 = vld [vmem:[%s1423_s19 + $0x190] sm:$0xff] }
  0x36   : > { %1037 = vst [vmem:[%s1462_s20 + $0x108] sm:$0xff] %v716_v63  ;;  %1038 = vst [vmem:[%s1462_s20 + $0x110] sm:$0xff] %v718_v0  ;;  %v720_v16 = vsel %vm666_vm0, %v708_v45, %v719_v1  ;;  %v926_v21 = vsel %vm907_vm1, %v387_v2, %v1414_v13  ;;  %v723_v22 = vrot.slane %v246_v62, 3  ;;  %v399_v23 = vrot.slane %v1612_v53, %v1405_v11  ;;  %v259_v0 = vld [vmem:[%s1423_s19 + $0x198] sm:$0xff] }
  0x37   : > { %1039 = vst [vmem:[%s1462_s20 + $0x118] sm:$0xff] %v720_v16  ;;  %v974_v27 = vsel %vm666_vm0, %v926_v21, %v721_v4  ;;  %v927_v28 = vsel %vm907_vm1, %v391_v5, %v1416_v14  ;;  %v928_v29 = vsel %vm907_vm1, %v395_v7, %v1418_v15  ;;  %v724_v30 = vrot.slane %v247_v3, 3  ;;  %v260_v21 = vld [vmem:[%s1423_s19 + $0x1a0] sm:$0xff] }
  0x38   : > { %1040 = vst [vmem:[%s1462_s20 + $0x120] sm:$0xff] %v974_v27  ;;  %v975_v33 = vsel %vm666_vm0, %v927_v28, %v722_v6  ;;  %v976_v34 = vsel %vm666_vm0, %v928_v29, %v723_v22  ;;  %v929_v35 = vsel %vm907_vm1, %v399_v23, %v1426_v17  ;;  %v403_v36 = vrot.slane %v1612_v53, %v1407_v12  ;;  %v262_v23 = vld [vmem:[%s1423_s19 + $0x1b0] sm:$0x7]  ;;  %v263_v28 = vld [vmem:[%s1423_s19 + $0x1b8] sm:$0x7] }
  0x39   : > { %1041 = vst [vmem:[%s1462_s20 + $0x128] sm:$0xff] %v975_v33  ;;  %1042 = vst [vmem:[%s1462_s20 + $0x130] sm:$0xff] %v976_v34  ;;  %v977_v39 = vsel %vm666_vm0, %v929_v35, %v724_v30  ;;  %v725_v40 = vrot.slane %v248_v24, 3  ;;  %v407_v41 = vrot.slane %v1612_v53, %v1430_v19  ;;  %v726_v42 = vrot.slane %v249_v25, 3  ;;  %v264_v29 = vld [vmem:[%s1423_s19 + $0x1c0] sm:$0x7] }
  0x3a   : > { %1043 = vst [vmem:[%s1462_s20 + $0x138] sm:$0xff] %v977_v39  ;;  %v930_v44 = vsel %vm907_vm1, %v403_v36, %v1428_v18  ;;  %v727_v45 = vrot.slane %v250_v26, 3  ;;  %v729_v46 = vrot.slane %v251_v31, 3  ;;  %v731_v47 = vrot.slane %v252_v32, 3  ;;  %v265_v34 = vld [vmem:[%s1423_s19 + $0x1c8] sm:$0x7] }
  0x3b   : > { %v978_v50 = vsel %vm666_vm0, %v930_v44, %v725_v40  ;;  %v931_v51 = vsel %vm907_vm1, %v407_v41, %v1432_v20  ;;  %v733_v53 = vrot.slane %v253_v37, 3  ;;  %v735_v54 = vrot.slane %v254_v38, 3  ;;  %v266_v35 = vld [vmem:[%s1423_s19 + $0x1d0] sm:$0x7] }
  0x3c   : > { %1044 = vst [vmem:[%s1462_s20 + $0x140] sm:$0xff] %v978_v50  ;;  %v979_v56 = vsel %vm666_vm0, %v931_v51, %v726_v42  ;;  %v728_v52 = vsel %vm666_vm0, %v721_v4, %v727_v45  ;;  %v730_v57 = vsel %vm666_vm0, %v722_v6, %v729_v46  ;;  %v732_v58 = vsel %vm666_vm0, %v723_v22, %v731_v47  ;;  %v261_v22 = vld [vmem:[%s1423_s19 + $0x1a8] sm:$0xff]  ;;  %v1750_v45 = vld [vmem:[%s1412_s10 + $0x1e] sm:$0x3f] }
  0x3d   : > { %1045 = vst [vmem:[%s1462_s20 + $0x148] sm:$0xff] %v979_v56  ;;  %1046 = vst [vmem:[%s1462_s20 + $0x150] sm:$0xff] %v728_v52  ;;  %v734_v60 = vsel %vm666_vm0, %v724_v30, %v733_v53  ;;  %v736_v61 = vsel %vm666_vm0, %v725_v40, %v735_v54  ;;  %v737_v62 = vrot.slane %v255_v43, 3  ;;  %v411_v63 = vrot.slane %v1681_v48, %v1399_v8  ;;  %v267_v40 = vld [vmem:[%s1423_s19 + $0x1d8] sm:$0x7]  ;;  %v1756_v51 = vld [vmem:[%s1423_s19 + $0x1e0] sm:$0xff] }
  0x3e   : > { %1047 = vst [vmem:[%s1462_s20 + $0x158] sm:$0xff] %v730_v57  ;;  %1048 = vst [vmem:[%s1462_s20 + $0x160] sm:$0xff] %v732_v58  ;;  %v739_v1 = vrot.slane %v1687_v49, 3  ;;  %v415_v2 = vrot.slane %v1681_v48, %v1401_v9  ;;  %v740_v3 = vrot.slane %v1690_v55, 3  ;;  %v419_v4 = vrot.slane %v1681_v48, %v1403_v10  ;;  %v1759_v53 = vld [vmem:[%s1423_s19 + $0x1e8] sm:$0xff]  ;;  %v270_v52 = vld [vmem:[%s1423_s19 + $0x1f0] sm:$0xff] }
  0x3f   : > { %1049 = vst [vmem:[%s1462_s20 + $0x168] sm:$0xff] %v734_v60  ;;  %1050 = vst [vmem:[%s1462_s20 + $0x170] sm:$0xff] %v736_v61  ;;  %v738_v5 = vsel %vm666_vm0, %v726_v42, %v737_v62  ;;  %v932_v6 = vsel %vm907_vm1, %v411_v63, %v1414_v13  ;;  %v741_v7 = vrot.slane %v258_v59, 3  ;;  %v423_v16 = vrot.slane %v1681_v48, %v1405_v11  ;;  %v271_v61 = vld [vmem:[%s1423_s19 + $0x1f8] sm:$0xff] }
  0x40   : > { %1051 = vst [vmem:[%s1462_s20 + $0x178] sm:$0xff] %v738_v5  ;;  %v980_v24 = vsel %vm666_vm0, %v932_v6, %v739_v1  ;;  %v933_v25 = vsel %vm907_vm1, %v415_v2, %v1416_v14  ;;  %v934_v26 = vsel %vm907_vm1, %v419_v4, %v1418_v15  ;;  %v742_v27 = vrot.slane %v259_v0, 3  ;;  %v272_v6 = vld [vmem:[%s1423_s19 + $0x200] sm:$0xff] }
  0x41   : > { %1052 = vst [vmem:[%s1462_s20 + $0x180] sm:$0xff] %v980_v24  ;;  %v981_v30 = vsel %vm666_vm0, %v933_v25, %v740_v3  ;;  %v982_v31 = vsel %vm666_vm0, %v934_v26, %v741_v7  ;;  %v935_v32 = vsel %vm907_vm1, %v423_v16, %v1426_v17  ;;  %v427_v33 = vrot.slane %v1681_v48, %v1407_v12  ;;  %v274_v16 = vld [vmem:[%s1423_s19 + $0x210] sm:$0x7]  ;;  %v275_v25 = vld [vmem:[%s1423_s19 + $0x218] sm:$0x7] }
  0x42   : > { %1053 = vst [vmem:[%s1462_s20 + $0x188] sm:$0xff] %v981_v30  ;;  %1054 = vst [vmem:[%s1462_s20 + $0x190] sm:$0xff] %v982_v31  ;;  %v983_v36 = vsel %vm666_vm0, %v935_v32, %v742_v27  ;;  %v743_v37 = vrot.slane %v260_v21, 3  ;;  %v431_v38 = vrot.slane %v1681_v48, %v1430_v19  ;;  %v744_v39 = vrot.slane %v261_v22, 3  ;;  %v276_v26 = vld [vmem:[%s1423_s19 + $0x220] sm:$0x7] }
  0x43   : > { %1055 = vst [vmem:[%s1462_s20 + $0x198] sm:$0xff] %v983_v36  ;;  %v936_v41 = vsel %vm907_vm1, %v427_v33, %v1428_v18  ;;  %v745_v42 = vrot.slane %v262_v23, 3  ;;  %v747_v43 = vrot.slane %v263_v28, 3  ;;  %v749_v44 = vrot.slane %v264_v29, 3  ;;  %v277_v31 = vld [vmem:[%s1423_s19 + $0x228] sm:$0x7] }
  0x44   : > { %v984_v46 = vsel %vm666_vm0, %v936_v41, %v743_v37  ;;  %v937_v47 = vsel %vm907_vm1, %v431_v38, %v1432_v20  ;;  %v751_v48 = vrot.slane %v265_v34, 3  ;;  %v753_v50 = vrot.slane %v266_v35, 3  ;;  %v278_v32 = vld [vmem:[%s1423_s19 + $0x230] sm:$0x7] }
  0x45   : > { %1056 = vst [vmem:[%s1462_s20 + $0x1a0] sm:$0xff] %v984_v46  ;;  %v985_v54 = vsel %vm666_vm0, %v937_v47, %v744_v39  ;;  %v746_v49 = vsel %vm666_vm0, %v739_v1, %v745_v42  ;;  %v748_v55 = vsel %vm666_vm0, %v740_v3, %v747_v43  ;;  %v750_v56 = vsel %vm666_vm0, %v741_v7, %v749_v44  ;;  %v273_v7 = vld [vmem:[%s1423_s19 + $0x208] sm:$0xff]  ;;  %v1825_v47 = vld [vmem:[%s1423_s19 + $0x240] sm:$0xff] }
  0x46   : > { %1057 = vst [vmem:[%s1462_s20 + $0x1a8] sm:$0xff] %v985_v54  ;;  %1058 = vst [vmem:[%s1462_s20 + $0x1b0] sm:$0xff] %v746_v49  ;;  %v752_v57 = vsel %vm666_vm0, %v742_v27, %v751_v48  ;;  %v754_v58 = vsel %vm666_vm0, %v743_v37, %v753_v50  ;;  %v755_v59 = vrot.slane %v267_v40, 3  ;;  %v435_v60 = vrot.slane %v1750_v45, %v1399_v8  ;;  %v279_v37 = vld [vmem:[%s1423_s19 + $0x238] sm:$0x7]  ;;  %v1828_v48 = vld [vmem:[%s1423_s19 + $0x248] sm:$0xff] }
  0x47   : > { %1059 = vst [vmem:[%s1462_s20 + $0x1b8] sm:$0xff] %v748_v55  ;;  %1060 = vst [vmem:[%s1462_s20 + $0x1c0] sm:$0xff] %v750_v56  ;;  %v757_v62 = vrot.slane %v1756_v51, 3  ;;  %v439_v63 = vrot.slane %v1750_v45, %v1401_v9  ;;  %v758_v0 = vrot.slane %v1759_v53, 3  ;;  %v443_v1 = vrot.slane %v1750_v45, %v1403_v10  ;;  %v1819_v42 = vld [vmem:[%s1412_s10 + $0x24] sm:$0x3f] }
  0x48   : > { %1061 = vst [vmem:[%s1462_s20 + $0x1c8] sm:$0xff] %v752_v57  ;;  %1062 = vst [vmem:[%s1462_s20 + $0x1d0] sm:$0xff] %v754_v58  ;;  %v756_v2 = vsel %vm666_vm0, %v744_v39, %v755_v59  ;;  %v938_v3 = vsel %vm907_vm1, %v435_v60, %v1414_v13  ;;  %v759_v4 = vrot.slane %v270_v52, 3  ;;  %v447_v5 = vrot.slane %v1750_v45, %v1405_v11  ;;  %v282_v49 = vld [vmem:[%s1423_s19 + $0x250] sm:$0xff]  ;;  %v283_v58 = vld [vmem:[%s1423_s19 + $0x258] sm:$0xff] }
  0x49   : > { %1063 = vst [vmem:[%s1462_s20 + $0x1d8] sm:$0xff] %v756_v2  ;;  %v986_v21 = vsel %vm666_vm0, %v938_v3, %v757_v62  ;;  %v939_v22 = vsel %vm907_vm1, %v439_v63, %v1416_v14  ;;  %v940_v23 = vsel %vm907_vm1, %v443_v1, %v1418_v15  ;;  %v760_v24 = vrot.slane %v271_v61, 3  ;;  %v284_v3 = vld [vmem:[%s1423_s19 + $0x260] sm:$0xff] }
  0x4a   : > { %1064 = vst [vmem:[%s1462_s20 + $0x1e0] sm:$0xff] %v986_v21  ;;  %v987_v27 = vsel %vm666_vm0, %v939_v22, %v758_v0  ;;  %v988_v28 = vsel %vm666_vm0, %v940_v23, %v759_v4  ;;  %v941_v29 = vsel %vm907_vm1, %v447_v5, %v1426_v17  ;;  %v451_v30 = vrot.slane %v1750_v45, %v1407_v12  ;;  %v286_v5 = vld [vmem:[%s1423_s19 + $0x270] sm:$0x7]  ;;  %v287_v22 = vld [vmem:[%s1423_s19 + $0x278] sm:$0x7] }
  0x4b   : > { %1065 = vst [vmem:[%s1462_s20 + $0x1e8] sm:$0xff] %v987_v27  ;;  %1066 = vst [vmem:[%s1462_s20 + $0x1f0] sm:$0xff] %v988_v28  ;;  %v989_v33 = vsel %vm666_vm0, %v941_v29, %v760_v24  ;;  %v761_v34 = vrot.slane %v272_v6, 3  ;;  %v455_v35 = vrot.slane %v1750_v45, %v1430_v19  ;;  %v762_v36 = vrot.slane %v273_v7, 3  ;;  %v288_v23 = vld [vmem:[%s1423_s19 + $0x280] sm:$0x7] }
  0x4c   : > { %1067 = vst [vmem:[%s1462_s20 + $0x1f8] sm:$0xff] %v989_v33  ;;  %v942_v38 = vsel %vm907_vm1, %v451_v30, %v1428_v18  ;;  %v763_v39 = vrot.slane %v274_v16, 3  ;;  %v765_v40 = vrot.slane %v275_v25, 3  ;;  %v767_v41 = vrot.slane %v276_v26, 3  ;;  %v289_v28 = vld [vmem:[%s1423_s19 + $0x288] sm:$0x7] }
  0x4d   : > { %v990_v43 = vsel %vm666_vm0, %v942_v38, %v761_v34  ;;  %v943_v44 = vsel %vm907_vm1, %v455_v35, %v1432_v20  ;;  %v769_v45 = vrot.slane %v277_v31, 3  ;;  %v771_v46 = vrot.slane %v278_v32, 3  ;;  %v290_v29 = vld [vmem:[%s1423_s19 + $0x290] sm:$0x7] }
  0x4e   : > { %1068 = vst [vmem:[%s1462_s20 + $0x200] sm:$0xff] %v990_v43  ;;  %v991_v50 = vsel %vm666_vm0, %v943_v44, %v762_v36  ;;  %v764_v51 = vsel %vm666_vm0, %v757_v62, %v763_v39  ;;  %v766_v53 = vsel %vm666_vm0, %v758_v0, %v765_v40  ;;  %v768_v54 = vsel %vm666_vm0, %v759_v4, %v767_v41  ;;  %v285_v4 = vld [vmem:[%s1423_s19 + $0x268] sm:$0xff]  ;;  %v1894_v44 = vld [vmem:[%s1423_s19 + $0x2a0] sm:$0xff] }
  0x4f   : > { %1069 = vst [vmem:[%s1462_s20 + $0x208] sm:$0xff] %v991_v50  ;;  %1070 = vst [vmem:[%s1462_s20 + $0x210] sm:$0xff] %v764_v51  ;;  %v770_v55 = vsel %vm666_vm0, %v760_v24, %v769_v45  ;;  %v772_v56 = vsel %vm666_vm0, %v761_v34, %v771_v46  ;;  %v773_v52 = vrot.slane %v279_v37, 3  ;;  %v459_v57 = vrot.slane %v1819_v42, %v1399_v8  ;;  %v291_v34 = vld [vmem:[%s1423_s19 + $0x298] sm:$0x7]  ;;  %v1897_v45 = vld [vmem:[%s1423_s19 + $0x2a8] sm:$0xff] }
  0x50   : > { %1071 = vst [vmem:[%s1462_s20 + $0x218] sm:$0xff] %v766_v53  ;;  %1072 = vst [vmem:[%s1462_s20 + $0x220] sm:$0xff] %v768_v54  ;;  %v775_v59 = vrot.slane %v1825_v47, 3  ;;  %v463_v60 = vrot.slane %v1819_v42, %v1401_v9  ;;  %v776_v61 = vrot.slane %v1828_v48, 3  ;;  %v467_v62 = vrot.slane %v1819_v42, %v1403_v10  ;;  %v1888_v39 = vld [vmem:[%s1412_s10 + $0x2a] sm:$0x3f] }
  0x51   : > { %1073 = vst [vmem:[%s1462_s20 + $0x228] sm:$0xff] %v770_v55  ;;  %1074 = vst [vmem:[%s1462_s20 + $0x230] sm:$0xff] %v772_v56  ;;  %v774_v63 = vsel %vm666_vm0, %v762_v36, %v773_v52  ;;  %v944_v0 = vsel %vm907_vm1, %v459_v57, %v1414_v13  ;;  %v777_v1 = vrot.slane %v282_v49, 3  ;;  %v471_v2 = vrot.slane %v1819_v42, %v1405_v11  ;;  %v294_v51 = vld [vmem:[%s1423_s19 + $0x2b0] sm:$0xff]  ;;  %v295_v56 = vld [vmem:[%s1423_s19 + $0x2b8] sm:$0xff] }
  0x52   : > { %1075 = vst [vmem:[%s1462_s20 + $0x238] sm:$0xff] %v774_v63  ;;  %v992_v6 = vsel %vm666_vm0, %v944_v0, %v775_v59  ;;  %v945_v7 = vsel %vm907_vm1, %v463_v60, %v1416_v14  ;;  %v946_v16 = vsel %vm907_vm1, %v467_v62, %v1418_v15  ;;  %v778_v21 = vrot.slane %v283_v58, 3  ;;  %v296_v63 = vld [vmem:[%s1423_s19 + $0x2c0] sm:$0xff]  ;;  %v298_v0 = vld [vmem:[%s1423_s19 + $0x2d0] sm:$0x7] }
  0x53   : > { %1076 = vst [vmem:[%s1462_s20 + $0x240] sm:$0xff] %v992_v6  ;;  %v993_v24 = vsel %vm666_vm0, %v945_v7, %v776_v61  ;;  %v994_v25 = vsel %vm666_vm0, %v946_v16, %v777_v1  ;;  %v947_v26 = vsel %vm907_vm1, %v471_v2, %v1426_v17  ;;  %v475_v27 = vrot.slane %v1819_v42, %v1407_v12  ;;  %v301_v7 = vld [vmem:[%s1423_s19 + $0x2e8] sm:$0x7]  ;;  %v302_v16 = vld [vmem:[%s1423_s19 + $0x2f0] sm:$0x7] }
  0x54   : > { %1077 = vst [vmem:[%s1462_s20 + $0x248] sm:$0xff] %v993_v24  ;;  %1078 = vst [vmem:[%s1462_s20 + $0x250] sm:$0xff] %v994_v25  ;;  %v995_v30 = vsel %vm666_vm0, %v947_v26, %v778_v21  ;;  %v779_v31 = vrot.slane %v284_v3, 3  ;;  %v479_v32 = vrot.slane %v1819_v42, %v1430_v19  ;;  %v780_v33 = vrot.slane %v285_v4, 3  ;;  %v299_v3 = vld [vmem:[%s1423_s19 + $0x2d8] sm:$0x7] }
  0x55   : > { %1079 = vst [vmem:[%s1462_s20 + $0x258] sm:$0xff] %v995_v30  ;;  %v948_v35 = vsel %vm907_vm1, %v475_v27, %v1428_v18  ;;  %v781_v36 = vrot.slane %v286_v5, 3  ;;  %v783_v37 = vrot.slane %v287_v22, 3  ;;  %v785_v38 = vrot.slane %v288_v23, 3  ;;  %v303_v26 = vld [vmem:[%s1423_s19 + $0x2f8] sm:$0x7] }
  0x56   : > { %v996_v40 = vsel %vm666_vm0, %v948_v35, %v779_v31  ;;  %v949_v41 = vsel %vm907_vm1, %v479_v32, %v1432_v20  ;;  %v787_v42 = vrot.slane %v289_v28, 3  ;;  %v789_v43 = vrot.slane %v290_v29, 3 }
  0x57   : > { %1080 = vst [vmem:[%s1462_s20 + $0x260] sm:$0xff] %v996_v40  ;;  %v997_v46 = vsel %vm666_vm0, %v949_v41, %v780_v33  ;;  %v782_v47 = vsel %vm666_vm0, %v775_v59, %v781_v36  ;;  %v784_v48 = vsel %vm666_vm0, %v776_v61, %v783_v37  ;;  %v786_v50 = vsel %vm666_vm0, %v777_v1, %v785_v38 }
  0x58   : > { %1081 = vst [vmem:[%s1462_s20 + $0x268] sm:$0xff] %v997_v46  ;;  %1082 = vst [vmem:[%s1462_s20 + $0x270] sm:$0xff] %v782_v47  ;;  %v788_v53 = vsel %vm666_vm0, %v778_v21, %v787_v42  ;;  %v790_v54 = vsel %vm666_vm0, %v779_v31, %v789_v43  ;;  %v791_v49 = vrot.slane %v291_v34, 3  ;;  %v483_v55 = vrot.slane %v1888_v39, %v1399_v8 }
  0x59   : > { %1083 = vst [vmem:[%s1462_s20 + $0x278] sm:$0xff] %v784_v48  ;;  %1084 = vst [vmem:[%s1462_s20 + $0x280] sm:$0xff] %v786_v50  ;;  %v793_v52 = vrot.slane %v1894_v44, 3  ;;  %v487_v57 = vrot.slane %v1888_v39, %v1401_v9  ;;  %v794_v58 = vrot.slane %v1897_v45, 3  ;;  %v491_v59 = vrot.slane %v1888_v39, %v1403_v10  ;;  %v297_v9 = vld [vmem:[%s1423_s19 + $0x2c8] sm:$0xff] }
  0x5a   : > { %1085 = vst [vmem:[%s1462_s20 + $0x288] sm:$0xff] %v788_v53  ;;  %1086 = vst [vmem:[%s1462_s20 + $0x290] sm:$0xff] %v790_v54  ;;  %v792_v60 = vsel %vm666_vm0, %v780_v33, %v791_v49  ;;  %v950_v8 = vsel %vm907_vm1, %v483_v55, %v1414_v13  ;;  %v795_v61 = vrot.slane %v294_v51, 3  ;;  %v495_v62 = vrot.slane %v1888_v39, %v1405_v11  ;;  %v300_v11 = vld [vmem:[%s1423_s19 + $0x2e0] sm:$0x7] }
  0x5b   : > { %1087 = vst [vmem:[%s1462_s20 + $0x298] sm:$0xff] %v792_v60  ;;  %v998_v1 = vsel %vm666_vm0, %v950_v8, %v793_v52  ;;  %v951_v10 = vsel %vm907_vm1, %v487_v57, %v1416_v14  ;;  %v952_v13 = vsel %vm907_vm1, %v491_v59, %v1418_v15  ;;  %v796_v2 = vrot.slane %v295_v56, 3 }
  0x5c   : > { %1088 = vst [vmem:[%s1462_s20 + $0x2a0] sm:$0xff] %v998_v1  ;;  %v999_v4 = vsel %vm666_vm0, %v951_v10, %v794_v58  ;;  %v1000_v5 = vsel %vm666_vm0, %v952_v13, %v795_v61  ;;  %v953_v6 = vsel %vm907_vm1, %v495_v62, %v1426_v17  ;;  %v499_v14 = vrot.slane %v1888_v39, %v1407_v12 }
  0x5d   : > { %1089 = vst [vmem:[%s1462_s20 + $0x2a8] sm:$0xff] %v999_v4  ;;  %1090 = vst [vmem:[%s1462_s20 + $0x2b0] sm:$0xff] %v1000_v5  ;;  %v1001_v15 = vsel %vm666_vm0, %v953_v6, %v796_v2  ;;  %v797_v21 = vrot.slane %v296_v63, 3  ;;  %v503_v22 = vrot.slane %v1888_v39, %v1430_v19  ;;  %v798_v23 = vrot.slane %v297_v9, 3 }
  0x5e   : > { %1091 = vst [vmem:[%s1462_s20 + $0x2b8] sm:$0xff] %v1001_v15  ;;  %v954_v17 = vsel %vm907_vm1, %v499_v14, %v1428_v18  ;;  %v799_v12 = vrot.slane %v298_v0, 3  ;;  %v801_v24 = vrot.slane %v299_v3, 3  ;;  %v803_v25 = vrot.slane %v300_v11, 3 }
  0x5f   : > { %v1002_v27 = vsel %vm666_vm0, %v954_v17, %v797_v21  ;;  %v955_v28 = vsel %vm907_vm1, %v503_v22, %v1432_v20  ;;  %v805_v19 = vrot.slane %v301_v7, 3  ;;  %v807_v29 = vrot.slane %v302_v16, 3 }
  0x60   : > { %1092 = vst [vmem:[%s1462_s20 + $0x2c0] sm:$0xff] %v1002_v27  ;;  %v1003_v18 = vsel %vm666_vm0, %v955_v28, %v798_v23  ;;  %v800_v30 = vsel %vm666_vm0, %v793_v52, %v799_v12  ;;  %v802_v31 = vsel %vm666_vm0, %v794_v58, %v801_v24  ;;  %v804_v32 = vsel %vm666_vm0, %v795_v61, %v803_v25 }
  0x61   : > { %1093 = vst [vmem:[%s1462_s20 + $0x2c8] sm:$0xff] %v1003_v18  ;;  %1094 = vst [vmem:[%s1462_s20 + $0x2d0] sm:$0xff] %v800_v30  ;;  %v806_v20 = vsel %vm666_vm0, %v796_v2, %v805_v19  ;;  %v808_v33 = vsel %vm666_vm0, %v797_v21, %v807_v29  ;;  %v809_v34 = vrot.slane %v303_v26, 3 }
  0x62   : > { %1095 = vst [vmem:[%s1462_s20 + $0x2d8] sm:$0xff] %v802_v31  ;;  %1096 = vst [vmem:[%s1462_s20 + $0x2e0] sm:$0xff] %v804_v32 }
  0x63   : > { %1097 = vst [vmem:[%s1462_s20 + $0x2e8] sm:$0xff] %v806_v20  ;;  %1098 = vst [vmem:[%s1462_s20 + $0x2f0] sm:$0xff] %v808_v33  ;;  %v810_v35 = vsel %vm666_vm0, %v798_v23, %v809_v34 }
  0x64   : > { %1099 = vst [vmem:[%s1462_s20 + $0x2f8] sm:$0xff] %v810_v35 }
  0x65   : > { %1262 = shalt.err (!%p1259_p3)
}
  0x66   : > { %s1263_s27 = scalar_lea.hbm %s1975_s28, 12288  ;;  %s1267_s9 = scalar_lea.hbm %s2029_s3, 24576 }
  0x67   : > { %p1264_p4 = scmp.ne.s32.totalorder %s1975_s28, %s1263_s27  ;;  %p1268_p9 = scmp.lt.u32.totalorder %s1975_s28, %s2029_s3 }
  0x68   : > { %p1269_p10 = scmp.lt.u32.totalorder %s1267_s9, %s1263_s27  ;;  %p1271_p12 = scmp.lt.u32.totalorder %s1263_s27, %s1975_s28 }
  0x69   : > { %p1265_p7 = pnand %p1264_p4, %p1374_p5 }
  0x6a   : > { %p1270_p11 = por %p1269_p10, %p1268_p9 }
  0x6b   : > { %p1266_p8 = pneg %p1265_p7 }
  0x6c   : > { %p1272_p13 = por %p1271_p12, %p1270_p11 }
  0x6e   : > { %p1273_p0 = pnand %p1272_p13, %p1266_p8 }
  0x70   : > { %1276 = shalt.err (!%p1273_p0)
}
  0x71   : > { %s1314_s17 = smov 768   ;;  %s1315_s19 = smov 48  }
  0x72   : > { %1205 = dma.vmem_to_hbm [thread:$0]  (%p1374_p5), %s1979_s16, 12288, %s1975_s28, %s1985_s29, %s1314_s17, %s1314_s17, %s1315_s19  }
  0x73 PF: > { %p1211_p1 = scmp.ge.s32.totalorder %s1311_s15, 2  ;;  %s1130_s20 = sand.u32 1, %s1299_s12  }
  0x74   : > { %s1131_s24 = scalar_lea.sflag [#allocation3], %s1130_s20 }
  0x75   : > { %p1208_p2 = pnand %p1211_p1, %p1378_p6 }
  0x77   : > { %1294 = dma.done.wait (!%p1208_p2), %s1131_s24, 12288  }
  0x78   : > { %1296 = vsyncadd (!%p1208_p2), %s1131_s24, 4294955008  ;;  %p13_p3 = scmp.ge.s32.totalorder %s1361_s18, 4   ;;  %s2032_s12 = smov %s1303_s13 }
  0x79   : > { %s2033_s13 = smov %s1307_s14  ;;  %s2034_s14 = smov %s1372_s21 }
  0x7a   : > { %s2035_s15 = smov %s1361_s18  ;;  %15 = sbr.rel (!%p13_p3) target bundleno = 3 (0x3), region = 70 }
  0x81   :  { %1136 = vsyncpa [#allocation3], 1 }
  0x82   :  { %1138 = vsyncpa [#allocation3 + $0x1], 1 }

</bundles_post_ra>
